<compile_context>
chip_gen: v6e
topology: v6e:2x2x1
jax: 0.10.0
libtpu: 0.0.40
codegen_flags: <defaults>
</compile_context>

<pallas_src>
import functools

import jax
import jax.numpy as jnp
from jax.experimental import pallas as pl
from jax.experimental.pallas import tpu as pltpu

SLOPE = 0.2
LN_EPS = 1e-5

# order of weight arrays passed to the kernel (after x)
PARAM_KEYS = [
    "w_in", "b_in",
    "ln1_g", "ln1_b", "w1a", "b1a", "w1b", "b1b",
    "ln2_g", "ln2_b", "w2a", "b2a", "w2b", "b2b",
]


def _leaky(x, slope=SLOPE):
    return jnp.where(x >= 0, x, slope * x)


def _layernorm(x, gamma, beta, eps=LN_EPS):
    mu = jnp.mean(x, axis=-1, keepdims=True)
    var = jnp.mean((x - mu) ** 2, axis=-1, keepdims=True)
    return (x - mu) * jax.lax.rsqrt(var + eps) * gamma + beta


def mlp_mixer_kernel(x_ref, w_in_ref, b_in_ref,
                     ln1g_ref, ln1b_ref, w1a_ref, b1a_ref, w1b_ref, b1b_ref,
                     ln2g_ref, ln2b_ref, w2a_ref, b2a_ref, w2b_ref, b2b_ref,
                     o_ref, h_ref, *, mm_dtype):
    # NOTE: the layer axis must remain the innermost grid axis.  h_ref carries the running
    # activation across layer steps; it is only valid because l == 0 fully overwrites it
    # for each new batch block.  Do not reorder the grid to (nlayers, nb).
    l = pl.program_id(1)
    nl = pl.num_programs(1)
    TB, S, C = h_ref.shape
    Din = x_ref.shape[2]
    f32 = jnp.float32

    # ---- in_net: Linear(input_dim, channel_dim) + LeakyReLU (only at layer step 0) ----
    @pl.when(l == 0)
    def _():
        xf = x_ref[...].reshape(TB * S, Din).astype(mm_dtype)
        h0 = jnp.dot(xf, w_in_ref[...], preferred_element_type=f32)
        h_ref[...] = _leaky(h0 + b_in_ref[...]).reshape(TB, S, C)

    h = h_ref[...]                                                   # (TB, S, C) f32

    # ---- token-mixing branch: ONE matmul pair with M = TB*C --------------------------
    # LN over channels, transpose (XLU) to (TB, C, S), merge leading dims (free) so the
    # MXU sees a single (TB*C, S) @ (S, S) matmul instead of TB tiny per-batch matmuls.
    y = _layernorm(h, ln1g_ref[...], ln1b_ref[...])                  # (TB, S, C) f32
    yt = jnp.swapaxes(y, 1, 2).reshape(TB * C, S).astype(mm_dtype)   # (TB*C, S)
    t = _leaky(jnp.dot(yt, w1a_ref[0], preferred_element_type=f32) + b1a_ref[0])
    t = jnp.dot(t.astype(mm_dtype), w1b_ref[0],
                preferred_element_type=f32) + b1b_ref[0]             # (TB*C, S) f32
    x2 = jnp.swapaxes(t.reshape(TB, C, S), 1, 2) + h                 # residual (dropout = id)
    h_ref[...] = x2                                                  # persist; let h/y/t die
    x2 = h_ref[...]

    # ---- channel-mixing branch: ONE matmul pair with M = TB*S ------------------------
    z = _layernorm(x2, ln2g_ref[...], ln2b_ref[...]).reshape(TB * S, C).astype(mm_dtype)
    u = _leaky(jnp.dot(z, w2a_ref[0], preferred_element_type=f32) + b2a_ref[0])
    u = jnp.dot(u.astype(mm_dtype), w2b_ref[0],
                preferred_element_type=f32) + b2b_ref[0]             # (TB*S, C) f32
    h_new = u.reshape(TB, S, C) + x2                                 # residual (dropout = id)
    h_ref[...] = h_new

    # ---- single lane-dense output store at the last layer ----------------------------
    @pl.when(l == nl - 1)
    def _():
        o_ref[...] = h_new.astype(o_ref.dtype)


def _tpu_hw_info():
    """(vmem_capacity_bytes, tensorcores_per_chip) with conservative fallbacks."""
    vmem = 64 * 2**20            # conservative default (v7x per-TC VMEM)
    try:
        info = pltpu.get_tpu_info()
        for name in ("vmem_capacity_bytes", "vmem_size_bytes", "vmem_bytes"):
            v = getattr(info, name, None)
            if v:
                vmem = int(v)
                break
    except Exception:
        pass
    n_tc = 1
    try:
        kind = jax.devices()[0].device_kind.lower()
        if "v7" in kind or "7x" in kind:
            n_tc = 2             # v7x: 2 TensorCores per chip share the grid's parallel axis
    except Exception:
        pass
    return vmem, n_tc


def _footprint_bytes(tb, S, C, Din):
    """Estimated per-step VMEM footprint (pipeline double-buffers inputs/outputs)."""
    bf16, f32 = 2, 4
    weights = 2 * ((Din * C + 2 * S * S + 2 * C * C) * bf16       # bf16 matmul weights (x2 buf)
                   + (7 * C + 2 * S) * f32)                       # biases + LN params (x2 buf)
    act_io = 2 * tb * S * Din * f32 + 2 * tb * S * C * f32        # x block + out block (x2 buf)
    scratch = tb * S * C * f32                                    # resident h accumulator
    temps = 3 * tb * S * C * f32 + tb * S * C * bf16              # live in-body temporaries
    return weights + act_io + scratch + temps


def _pick_tb(B, S, C, Din, vmem_budget, n_tc):
    """Generation-aware batch tile.

    1-TC chips (v5e/v6e): largest tile that fits the budget (ideally nb=1 so each layer's
    weights are streamed exactly once).  Multi-TC chips (v7x): prefer the largest tile that
    keeps the number of batch grid steps a multiple of the core count (nb=2 ideally)."""
    divisors = [d for d in range(B, 0, -1) if B % d == 0]
    fits = [d for d in divisors if _footprint_bytes(d, S, C, Din) <= vmem_budget]
    if not fits:
        return 1
    if n_tc >= 2:
        even = [d for d in fits if (B // d) % n_tc == 0]
        if even:
            return even[0]
    return fits[0]


def mlp_mixer_pallas(x, params, nlayers, *, tb=None, mm_dtype=jnp.bfloat16,
                     out_dtype=jnp.float32):
    B, S, Din = x.shape
    C = params["w_in"].shape[1]
    L = nlayers

    vmem_cap, n_tc = _tpu_hw_info()
    # Leave headroom for Mosaic internal scratch/spills: max(8 MiB, capacity/8)
    # => <= 56 MiB on v7x (64 MiB VMEM), <= 112 MiB on v5e/v6e (128 MiB VMEM).
    vmem_budget = max(16 * 2**20, vmem_cap - max(8 * 2**20, vmem_cap // 8))

    if tb is None:
        tb = _pick_tb(B, S, C, Din, vmem_budget, n_tc)
    assert B % tb == 0, "batch tile must divide batch"
    nb = B // tb

    # Host-side prep: reshape biases / LN params for direct broadcast (no per-layer
    # broadcast_in_dim in the kernel) and cast MXU weights to bf16 (accumulation stays f32).
    prep = {
        "w_in": params["w_in"].astype(mm_dtype),
        "b_in": params["b_in"].reshape(1, C).astype(jnp.float32),
        "ln1_g": params["ln1_g"].reshape(L, 1, C).astype(jnp.float32),
        "ln1_b": params["ln1_b"].reshape(L, 1, C).astype(jnp.float32),
        "w1a": params["w1a"].astype(mm_dtype),
        "b1a": params["b1a"].reshape(L, 1, S).astype(jnp.float32),
        "w1b": params["w1b"].astype(mm_dtype),
        "b1b": params["b1b"].reshape(L, 1, S).astype(jnp.float32),
        "ln2_g": params["ln2_g"].reshape(L, 1, C).astype(jnp.float32),
        "ln2_b": params["ln2_b"].reshape(L, 1, C).astype(jnp.float32),
        "w2a": params["w2a"].astype(mm_dtype),
        "b2a": params["b2a"].reshape(L, 1, C).astype(jnp.float32),
        "w2b": params["w2b"].astype(mm_dtype),
        "b2b": params["b2b"].reshape(L, 1, C).astype(jnp.float32),
    }
    weights = [prep[k] for k in PARAM_KEYS]

    def shared_spec(shape):
        nd = len(shape)
        return pl.BlockSpec(shape, lambda b, l, _n=nd: (0,) * _n)

    def layer_spec(tail_shape):
        nd = len(tail_shape)
        return pl.BlockSpec((1,) + tail_shape, lambda b, l, _n=nd: (l,) + (0,) * _n)

    spec_of = {
        "w_in": shared_spec((Din, C)),
        "b_in": shared_spec((1, C)),
        "ln1_g": layer_spec((1, C)), "ln1_b": layer_spec((1, C)),
        "w1a": layer_spec((S, S)), "b1a": layer_spec((1, S)),
        "w1b": layer_spec((S, S)), "b1b": layer_spec((1, S)),
        "ln2_g": layer_spec((1, C)), "ln2_b": layer_spec((1, C)),
        "w2a": layer_spec((C, C)), "b2a": layer_spec((1, C)),
        "w2b": layer_spec((C, C)), "b2b": layer_spec((1, C)),
    }
    in_specs = [pl.BlockSpec((tb, S, Din), lambda b, l: (b, 0, 0))]
    in_specs += [spec_of[k] for k in PARAM_KEYS]
    out_spec = pl.BlockSpec((tb, S, C), lambda b, l: (b, 0, 0))

    footprint = _footprint_bytes(tb, S, C, Din)
    vmem_limit = int(min(vmem_budget, max(32 * 2**20, int(1.5 * footprint))))

    # Advisory cost estimate for XLA's scheduler around the custom call.
    flops = 2 * B * S * Din * C + 4 * B * S * C * (S + C) * L
    weight_bytes = sum(int(w.size) * w.dtype.itemsize for w in weights)
    bytes_accessed = int(x.size * x.dtype.itemsize
                         + B * S * C * jnp.dtype(out_dtype).itemsize
                         + weight_bytes * nb)      # per-layer weights re-streamed nb times
    try:
        cost = pl.CostEstimate(flops=int(flops), transcendentals=int(2 * B * S * L),
                               bytes_accessed=bytes_accessed)
    except Exception:
        cost = None

    kernel = functools.partial(mlp_mixer_kernel, mm_dtype=mm_dtype)
    return pl.pallas_call(
        kernel,
        out_shape=jax.ShapeDtypeStruct((B, S, C), out_dtype),
        grid_spec=pltpu.PrefetchScalarGridSpec(
            num_scalar_prefetch=0,
            grid=(nb, nlayers),          # layer axis innermost (required by h_ref carry)
            in_specs=in_specs,
            out_specs=out_spec,
            scratch_shapes=[pltpu.VMEM((tb, S, C), jnp.float32)],
        ),
        compiler_params=pltpu.CompilerParams(
            dimension_semantics=("parallel", "arbitrary"),
            vmem_limit_bytes=vmem_limit,
        ),
        cost_estimate=cost,
    )(x, *weights)


def mlp_mixer_ref(x, params, nlayers, mm_dtype=jnp.bfloat16):
    """Pure-JAX reference mirroring the PyTorch forward (eval mode) with the same
    bf16-operand / f32-accumulate matmul precision as the kernel."""
    def mm(a, b):
        return jnp.matmul(a.astype(mm_dtype), b.astype(mm_dtype),
                          preferred_element_type=jnp.float32)

    h = _leaky(mm(x, params["w_in"]) + params["b_in"])
    for l in range(nlayers):
        y = _layernorm(h, params["ln1_g"][l], params["ln1_b"][l])
        y_t = jnp.swapaxes(y, 1, 2)                                   # (B, C, S)
        t = _leaky(mm(y_t, params["w1a"][l]) + params["b1a"][l])
        t = mm(t, params["w1b"][l]) + params["b1b"][l]
        x2 = jnp.swapaxes(t, 1, 2) + h
        z = _layernorm(x2, params["ln2_g"][l], params["ln2_b"][l])
        u = _leaky(mm(z, params["w2a"][l]) + params["b2a"][l])
        u = mm(u, params["w2b"][l]) + params["b2b"][l]
        h = u + x2
    return h


def init_params(key, input_dim, channel_dim, seq_len, nlayers):
    ks = jax.random.split(key, 10)
    scale = 0.1
    return {
        "w_in": scale * jax.random.normal(ks[0], (input_dim, channel_dim), jnp.float32),
        "b_in": scale * jax.random.normal(ks[1], (1, channel_dim), jnp.float32),
        # LayerNorm params: PyTorch default init (ones / zeros)
        "ln1_g": jnp.ones((nlayers, channel_dim), jnp.float32),
        "ln1_b": jnp.zeros((nlayers, channel_dim), jnp.float32),
        "ln2_g": jnp.ones((nlayers, channel_dim), jnp.float32),
        "ln2_b": jnp.zeros((nlayers, channel_dim), jnp.float32),
        # token-mixing MLP (acts over seq_len)
        "w1a": scale * jax.random.normal(ks[2], (nlayers, seq_len, seq_len), jnp.float32),
        "b1a": scale * jax.random.normal(ks[3], (nlayers, seq_len), jnp.float32),
        "w1b": scale * jax.random.normal(ks[4], (nlayers, seq_len, seq_len), jnp.float32),
        "b1b": scale * jax.random.normal(ks[5], (nlayers, seq_len), jnp.float32),
        # channel-mixing MLP (acts over channel_dim)
        "w2a": scale * jax.random.normal(ks[6], (nlayers, channel_dim, channel_dim), jnp.float32),
        "b2a": scale * jax.random.normal(ks[7], (nlayers, channel_dim), jnp.float32),
        "w2b": scale * jax.random.normal(ks[8], (nlayers, channel_dim, channel_dim), jnp.float32),
        "b2b": scale * jax.random.normal(ks[9], (nlayers, channel_dim), jnp.float32),
    }


if __name__ == "__main__":
    # Small shapes consistent with the module's forward: (B, seq_len, input_dim)
    B, S, Din, C, L = 2, 8, 4, 32, 2

    key = jax.random.PRNGKey(0)
    k_x, k_p = jax.random.split(key)
    x = jax.random.normal(k_x, (B, S, Din), jnp.float32)
    params = init_params(k_p, Din, C, S, L)

    out = mlp_mixer_pallas(x, params, L)
    out = jax.block_until_ready(out)

    ref = mlp_mixer_ref(x, params, L)
    assert out.shape == (B, S, C)
    max_err = float(jnp.max(jnp.abs(out - ref)))
    assert jnp.allclose(out, ref, rtol=1e-2, atol=1e-2), (
        f"Pallas output mismatch vs JAX reference (max abs err {max_err})")

    print("KERNEL_OK")
</pallas_src>

<mosaic_0001>
module attributes {stable_mosaic.version = 11 : i64} {
  func.func @mlp_mixer_kernel(%arg0: i32, %arg1: i32, %arg2: memref<2x8x4xf32, #tpu.memory_space<vmem>>, %arg3: memref<4x32xbf16, #tpu.memory_space<vmem>>, %arg4: memref<1x32xf32, #tpu.memory_space<vmem>>, %arg5: memref<1x1x32xf32, #tpu.memory_space<vmem>>, %arg6: memref<1x1x32xf32, #tpu.memory_space<vmem>>, %arg7: memref<1x8x8xbf16, #tpu.memory_space<vmem>>, %arg8: memref<1x1x8xf32, #tpu.memory_space<vmem>>, %arg9: memref<1x8x8xbf16, #tpu.memory_space<vmem>>, %arg10: memref<1x1x8xf32, #tpu.memory_space<vmem>>, %arg11: memref<1x1x32xf32, #tpu.memory_space<vmem>>, %arg12: memref<1x1x32xf32, #tpu.memory_space<vmem>>, %arg13: memref<1x32x32xbf16, #tpu.memory_space<vmem>>, %arg14: memref<1x1x32xf32, #tpu.memory_space<vmem>>, %arg15: memref<1x32x32xbf16, #tpu.memory_space<vmem>>, %arg16: memref<1x1x32xf32, #tpu.memory_space<vmem>>, %arg17: memref<2x8x32xf32, #tpu.memory_space<vmem>>, %arg18: memref<2x8x32xf32, #tpu.memory_space<vmem>>) attributes {dimension_semantics = [#tpu.dimension_semantics<parallel>, #tpu.dimension_semantics<arbitrary>], iteration_bounds = array<i64: 1, 2>, scalar_prefetch = 0 : i64, scratch_operands = 1 : i64, tpu.core_type = #tpu.core_type<tc>, window_params = [{transform_indices = @transform_0, window_bounds = array<i64: 2, 8, 4>}, {pipeline_mode = #tpu.pipeline_mode<synchronous>, transform_indices = @transform_1, window_bounds = array<i64: 4, 32>}, {pipeline_mode = #tpu.pipeline_mode<synchronous>, transform_indices = @transform_2, window_bounds = array<i64: 1, 32>}, {transform_indices = @transform_3, window_bounds = array<i64: 1, 1, 32>}, {transform_indices = @transform_4, window_bounds = array<i64: 1, 1, 32>}, {transform_indices = @transform_5, window_bounds = array<i64: 1, 8, 8>}, {transform_indices = @transform_6, window_bounds = array<i64: 1, 1, 8>}, {transform_indices = @transform_7, window_bounds = array<i64: 1, 8, 8>}, {transform_indices = @transform_8, window_bounds = array<i64: 1, 1, 8>}, {transform_indices = @transform_9, window_bounds = array<i64: 1, 1, 32>}, {transform_indices = @transform_10, window_bounds = array<i64: 1, 1, 32>}, {transform_indices = @transform_11, window_bounds = array<i64: 1, 32, 32>}, {transform_indices = @transform_12, window_bounds = array<i64: 1, 1, 32>}, {transform_indices = @transform_13, window_bounds = array<i64: 1, 32, 32>}, {transform_indices = @transform_14, window_bounds = array<i64: 1, 1, 32>}, {transform_indices = @transform_15, window_bounds = array<i64: 2, 8, 32>}]} {
    %c0_i32 = arith.constant 0 : i32
    %0 = arith.cmpi eq, %arg1, %c0_i32 : i32
    %1 = arith.extui %0 : i1 to i32
    %c0_i32_0 = arith.constant 0 : i32
    %2 = arith.cmpi ne, %1, %c0_i32_0 : i32
    scf.if %2 {
      %c0_66 = arith.constant 0 : index
      %c0_67 = arith.constant 0 : index
      %c0_68 = arith.constant 0 : index
      %108 = vector.load %arg2[%c0_66, %c0_67, %c0_68] : memref<2x8x4xf32, #tpu.memory_space<vmem>>, vector<2x8x4xf32>
      %109 = vector.shape_cast %108 : vector<2x8x4xf32> to vector<16x4xf32>
      %110 = arith.truncf %109 : vector<16x4xf32> to vector<16x4xbf16>
      %c0_69 = arith.constant 0 : index
      %c0_70 = arith.constant 0 : index
      %111 = vector.load %arg3[%c0_69, %c0_70] : memref<4x32xbf16, #tpu.memory_space<vmem>>, vector<4x32xbf16>
      %cst_71 = arith.constant dense<0.000000e+00> : vector<16x32xf32>
      %112 = tpu.matmul %110, %111, %cst_71 {dimension_numbers = #tpu.dot_dimension_numbers<[1], [0], [0], [1], [0, 0, 1, 1], [], []>} : vector<16x4xbf16>, vector<4x32xbf16>, vector<16x32xf32> -> vector<16x32xf32>
      %c0_72 = arith.constant 0 : index
      %c0_73 = arith.constant 0 : index
      %113 = vector.load %arg4[%c0_72, %c0_73] : memref<1x32xf32, #tpu.memory_space<vmem>>, vector<1x32xf32>
      %114 = vector.broadcast %113 : vector<1x32xf32> to vector<16x32xf32>
      %115 = arith.addf %112, %114 : vector<16x32xf32>
      %cst_74 = arith.constant 0.000000e+00 : f32
      %116 = vector.broadcast %cst_74 : f32 to vector<16x32xf32>
      %117 = arith.cmpf oge, %115, %116 : vector<16x32xf32>
      %cst_75 = arith.constant 2.000000e-01 : f32
      %118 = vector.broadcast %cst_75 : f32 to vector<16x32xf32>
      %119 = arith.mulf %118, %115 : vector<16x32xf32>
      %120 = arith.select %117, %115, %119 : vector<16x32xi1>, vector<16x32xf32>
      %121 = vector.shape_cast %120 : vector<16x32xf32> to vector<2x8x32xf32>
      %c0_76 = arith.constant 0 : index
      %c0_77 = arith.constant 0 : index
      %c0_78 = arith.constant 0 : index
      %122 = vector.load %arg18[%c0_76, %c0_77, %c0_78] : memref<2x8x32xf32, #tpu.memory_space<vmem>>, vector<2x8x32xf32>
      tpu.vector_store %arg18[%c0_76, %c0_77, %c0_78], %121 {strides = array<i32>} : memref<2x8x32xf32, #tpu.memory_space<vmem>>, vector<2x8x32xf32>,
    } else {
    }
    %c0 = arith.constant 0 : index
    %c0_1 = arith.constant 0 : index
    %c0_2 = arith.constant 0 : index
    %3 = vector.load %arg18[%c0, %c0_1, %c0_2] : memref<2x8x32xf32, #tpu.memory_space<vmem>>, vector<2x8x32xf32>
    %c0_3 = arith.constant 0 : index
    %c0_4 = arith.constant 0 : index
    %c0_5 = arith.constant 0 : index
    %4 = vector.load %arg5[%c0_3, %c0_4, %c0_5] : memref<1x1x32xf32, #tpu.memory_space<vmem>>, vector<1x1x32xf32>
    %c0_6 = arith.constant 0 : index
    %c0_7 = arith.constant 0 : index
    %c0_8 = arith.constant 0 : index
    %5 = vector.load %arg6[%c0_6, %c0_7, %c0_8] : memref<1x1x32xf32, #tpu.memory_space<vmem>>, vector<1x1x32xf32>
    %cst = arith.constant dense<0.000000e+00> : vector<2x8xf32>
    %6 = vector.multi_reduction <add>, %3, %cst [2] : vector<2x8x32xf32> to vector<2x8xf32>
    %7 = vector.shape_cast %6 : vector<2x8xf32> to vector<2x8x1xf32>
    %cst_9 = arith.constant 3.200000e+01 : f32
    %8 = vector.broadcast %cst_9 : f32 to vector<2x8x1xf32>
    %9 = arith.divf %7, %8 : vector<2x8x1xf32>
    %10 = vector.broadcast %9 : vector<2x8x1xf32> to vector<2x8x32xf32>
    %11 = arith.subf %3, %10 : vector<2x8x32xf32>
    %12 = arith.mulf %11, %11 : vector<2x8x32xf32>
    %cst_10 = arith.constant dense<0.000000e+00> : vector<2x8xf32>
    %13 = vector.multi_reduction <add>, %12, %cst_10 [2] : vector<2x8x32xf32> to vector<2x8xf32>
    %14 = vector.shape_cast %13 : vector<2x8xf32> to vector<2x8x1xf32>
    %cst_11 = arith.constant 3.200000e+01 : f32
    %15 = vector.broadcast %cst_11 : f32 to vector<2x8x1xf32>
    %16 = arith.divf %14, %15 : vector<2x8x1xf32>
    %17 = vector.broadcast %9 : vector<2x8x1xf32> to vector<2x8x32xf32>
    %18 = arith.subf %3, %17 : vector<2x8x32xf32>
    %cst_12 = arith.constant 9.99999974E-6 : f32
    %19 = vector.broadcast %cst_12 : f32 to vector<2x8x1xf32>
    %20 = arith.addf %16, %19 : vector<2x8x1xf32>
    %21 = math.rsqrt %20 : vector<2x8x1xf32>
    %22 = vector.broadcast %21 : vector<2x8x1xf32> to vector<2x8x32xf32>
    %23 = arith.mulf %18, %22 : vector<2x8x32xf32>
    %24 = vector.broadcast %4 : vector<1x1x32xf32> to vector<2x8x32xf32>
    %25 = arith.mulf %23, %24 : vector<2x8x32xf32>
    %26 = vector.broadcast %5 : vector<1x1x32xf32> to vector<2x8x32xf32>
    %27 = arith.addf %25, %26 : vector<2x8x32xf32>
    %28 = tpu.transpose %27, [0, 2, 1] : vector<2x8x32xf32> -> vector<2x32x8xf32>
    %29 = vector.shape_cast %28 : vector<2x32x8xf32> to vector<64x8xf32>
    %30 = arith.truncf %29 : vector<64x8xf32> to vector<64x8xbf16>
    %c0_13 = arith.constant 0 : index
    %c0_14 = arith.constant 0 : index
    %c0_15 = arith.constant 0 : index
    %31 = vector.load %arg7[%c0_13, %c0_14, %c0_15] : memref<1x8x8xbf16, #tpu.memory_space<vmem>>, vector<1x8x8xbf16>
    %32 = vector.shape_cast %31 : vector<1x8x8xbf16> to vector<8x8xbf16>
    %cst_16 = arith.constant dense<0.000000e+00> : vector<64x8xf32>
    %33 = tpu.matmul %30, %32, %cst_16 {dimension_numbers = #tpu.dot_dimension_numbers<[1], [0], [0], [1], [0, 0, 1, 1], [], []>} : vector<64x8xbf16>, vector<8x8xbf16>, vector<64x8xf32> -> vector<64x8xf32>
    %c0_17 = arith.constant 0 : index
    %c0_18 = arith.constant 0 : index
    %c0_19 = arith.constant 0 : index
    %34 = vector.load %arg8[%c0_17, %c0_18, %c0_19] : memref<1x1x8xf32, #tpu.memory_space<vmem>>, vector<1x1x8xf32>
    %35 = vector.shape_cast %34 : vector<1x1x8xf32> to vector<1x8xf32>
    %36 = vector.broadcast %35 : vector<1x8xf32> to vector<64x8xf32>
    %37 = arith.addf %33, %36 : vector<64x8xf32>
    %cst_20 = arith.constant 0.000000e+00 : f32
    %38 = vector.broadcast %cst_20 : f32 to vector<64x8xf32>
    %39 = arith.cmpf oge, %37, %38 : vector<64x8xf32>
    %cst_21 = arith.constant 2.000000e-01 : f32
    %40 = vector.broadcast %cst_21 : f32 to vector<64x8xf32>
    %41 = arith.mulf %40, %37 : vector<64x8xf32>
    %42 = arith.select %39, %37, %41 : vector<64x8xi1>, vector<64x8xf32>
    %43 = arith.truncf %42 : vector<64x8xf32> to vector<64x8xbf16>
    %c0_22 = arith.constant 0 : index
    %c0_23 = arith.constant 0 : index
    %c0_24 = arith.constant 0 : index
    %44 = vector.load %arg9[%c0_22, %c0_23, %c0_24] : memref<1x8x8xbf16, #tpu.memory_space<vmem>>, vector<1x8x8xbf16>
    %45 = vector.shape_cast %44 : vector<1x8x8xbf16> to vector<8x8xbf16>
    %cst_25 = arith.constant dense<0.000000e+00> : vector<64x8xf32>
    %46 = tpu.matmul %43, %45, %cst_25 {dimension_numbers = #tpu.dot_dimension_numbers<[1], [0], [0], [1], [0, 0, 1, 1], [], []>} : vector<64x8xbf16>, vector<8x8xbf16>, vector<64x8xf32> -> vector<64x8xf32>
    %c0_26 = arith.constant 0 : index
    %c0_27 = arith.constant 0 : index
    %c0_28 = arith.constant 0 : index
    %47 = vector.load %arg10[%c0_26, %c0_27, %c0_28] : memref<1x1x8xf32, #tpu.memory_space<vmem>>, vector<1x1x8xf32>
    %48 = vector.shape_cast %47 : vector<1x1x8xf32> to vector<1x8xf32>
    %49 = vector.broadcast %48 : vector<1x8xf32> to vector<64x8xf32>
    %50 = arith.addf %46, %49 : vector<64x8xf32>
    %51 = vector.shape_cast %50 : vector<64x8xf32> to vector<2x32x8xf32>
    %52 = tpu.transpose %51, [0, 2, 1] : vector<2x32x8xf32> -> vector<2x8x32xf32>
    %53 = arith.addf %52, %3 : vector<2x8x32xf32>
    %c0_29 = arith.constant 0 : index
    %c0_30 = arith.constant 0 : index
    %c0_31 = arith.constant 0 : index
    %54 = vector.load %arg18[%c0_29, %c0_30, %c0_31] : memref<2x8x32xf32, #tpu.memory_space<vmem>>, vector<2x8x32xf32>
    tpu.vector_store %arg18[%c0_29, %c0_30, %c0_31], %53 {strides = array<i32>} : memref<2x8x32xf32, #tpu.memory_space<vmem>>, vector<2x8x32xf32>,
    %c0_32 = arith.constant 0 : index
    %c0_33 = arith.constant 0 : index
    %c0_34 = arith.constant 0 : index
    %55 = vector.load %arg18[%c0_32, %c0_33, %c0_34] : memref<2x8x32xf32, #tpu.memory_space<vmem>>, vector<2x8x32xf32>
    %c0_35 = arith.constant 0 : index
    %c0_36 = arith.constant 0 : index
    %c0_37 = arith.constant 0 : index
    %56 = vector.load %arg11[%c0_35, %c0_36, %c0_37] : memref<1x1x32xf32, #tpu.memory_space<vmem>>, vector<1x1x32xf32>
    %c0_38 = arith.constant 0 : index
    %c0_39 = arith.constant 0 : index
    %c0_40 = arith.constant 0 : index
    %57 = vector.load %arg12[%c0_38, %c0_39, %c0_40] : memref<1x1x32xf32, #tpu.memory_space<vmem>>, vector<1x1x32xf32>
    %cst_41 = arith.constant dense<0.000000e+00> : vector<2x8xf32>
    %58 = vector.multi_reduction <add>, %55, %cst_41 [2] : vector<2x8x32xf32> to vector<2x8xf32>
    %59 = vector.shape_cast %58 : vector<2x8xf32> to vector<2x8x1xf32>
    %cst_42 = arith.constant 3.200000e+01 : f32
    %60 = vector.broadcast %cst_42 : f32 to vector<2x8x1xf32>
    %61 = arith.divf %59, %60 : vector<2x8x1xf32>
    %62 = vector.broadcast %61 : vector<2x8x1xf32> to vector<2x8x32xf32>
    %63 = arith.subf %55, %62 : vector<2x8x32xf32>
    %64 = arith.mulf %63, %63 : vector<2x8x32xf32>
    %cst_43 = arith.constant dense<0.000000e+00> : vector<2x8xf32>
    %65 = vector.multi_reduction <add>, %64, %cst_43 [2] : vector<2x8x32xf32> to vector<2x8xf32>
    %66 = vector.shape_cast %65 : vector<2x8xf32> to vector<2x8x1xf32>
    %cst_44 = arith.constant 3.200000e+01 : f32
    %67 = vector.broadcast %cst_44 : f32 to vector<2x8x1xf32>
    %68 = arith.divf %66, %67 : vector<2x8x1xf32>
    %69 = vector.broadcast %61 : vector<2x8x1xf32> to vector<2x8x32xf32>
    %70 = arith.subf %55, %69 : vector<2x8x32xf32>
    %cst_45 = arith.constant 9.99999974E-6 : f32
    %71 = vector.broadcast %cst_45 : f32 to vector<2x8x1xf32>
    %72 = arith.addf %68, %71 : vector<2x8x1xf32>
    %73 = math.rsqrt %72 : vector<2x8x1xf32>
    %74 = vector.broadcast %73 : vector<2x8x1xf32> to vector<2x8x32xf32>
    %75 = arith.mulf %70, %74 : vector<2x8x32xf32>
    %76 = vector.broadcast %56 : vector<1x1x32xf32> to vector<2x8x32xf32>
    %77 = arith.mulf %75, %76 : vector<2x8x32xf32>
    %78 = vector.broadcast %57 : vector<1x1x32xf32> to vector<2x8x32xf32>
    %79 = arith.addf %77, %78 : vector<2x8x32xf32>
    %80 = vector.shape_cast %79 : vector<2x8x32xf32> to vector<16x32xf32>
    %81 = arith.truncf %80 : vector<16x32xf32> to vector<16x32xbf16>
    %c0_46 = arith.constant 0 : index
    %c0_47 = arith.constant 0 : index
    %c0_48 = arith.constant 0 : index
    %82 = vector.load %arg13[%c0_46, %c0_47, %c0_48] : memref<1x32x32xbf16, #tpu.memory_space<vmem>>, vector<1x32x32xbf16>
    %83 = vector.shape_cast %82 : vector<1x32x32xbf16> to vector<32x32xbf16>
    %cst_49 = arith.constant dense<0.000000e+00> : vector<16x32xf32>
    %84 = tpu.matmul %81, %83, %cst_49 {dimension_numbers = #tpu.dot_dimension_numbers<[1], [0], [0], [1], [0, 0, 1, 1], [], []>} : vector<16x32xbf16>, vector<32x32xbf16>, vector<16x32xf32> -> vector<16x32xf32>
    %c0_50 = arith.constant 0 : index
    %c0_51 = arith.constant 0 : index
    %c0_52 = arith.constant 0 : index
    %85 = vector.load %arg14[%c0_50, %c0_51, %c0_52] : memref<1x1x32xf32, #tpu.memory_space<vmem>>, vector<1x1x32xf32>
    %86 = vector.shape_cast %85 : vector<1x1x32xf32> to vector<1x32xf32>
    %87 = vector.broadcast %86 : vector<1x32xf32> to vector<16x32xf32>
    %88 = arith.addf %84, %87 : vector<16x32xf32>
    %cst_53 = arith.constant 0.000000e+00 : f32
    %89 = vector.broadcast %cst_53 : f32 to vector<16x32xf32>
    %90 = arith.cmpf oge, %88, %89 : vector<16x32xf32>
    %cst_54 = arith.constant 2.000000e-01 : f32
    %91 = vector.broadcast %cst_54 : f32 to vector<16x32xf32>
    %92 = arith.mulf %91, %88 : vector<16x32xf32>
    %93 = arith.select %90, %88, %92 : vector<16x32xi1>, vector<16x32xf32>
    %94 = arith.truncf %93 : vector<16x32xf32> to vector<16x32xbf16>
    %c0_55 = arith.constant 0 : index
    %c0_56 = arith.constant 0 : index
    %c0_57 = arith.constant 0 : index
    %95 = vector.load %arg15[%c0_55, %c0_56, %c0_57] : memref<1x32x32xbf16, #tpu.memory_space<vmem>>, vector<1x32x32xbf16>
    %96 = vector.shape_cast %95 : vector<1x32x32xbf16> to vector<32x32xbf16>
    %cst_58 = arith.constant dense<0.000000e+00> : vector<16x32xf32>
    %97 = tpu.matmul %94, %96, %cst_58 {dimension_numbers = #tpu.dot_dimension_numbers<[1], [0], [0], [1], [0, 0, 1, 1], [], []>} : vector<16x32xbf16>, vector<32x32xbf16>, vector<16x32xf32> -> vector<16x32xf32>
    %c0_59 = arith.constant 0 : index
    %c0_60 = arith.constant 0 : index
    %c0_61 = arith.constant 0 : index
    %98 = vector.load %arg16[%c0_59, %c0_60, %c0_61] : memref<1x1x32xf32, #tpu.memory_space<vmem>>, vector<1x1x32xf32>
    %99 = vector.shape_cast %98 : vector<1x1x32xf32> to vector<1x32xf32>
    %100 = vector.broadcast %99 : vector<1x32xf32> to vector<16x32xf32>
    %101 = arith.addf %97, %100 : vector<16x32xf32>
    %102 = vector.shape_cast %101 : vector<16x32xf32> to vector<2x8x32xf32>
    %103 = arith.addf %102, %55 : vector<2x8x32xf32>
    %c0_62 = arith.constant 0 : index
    %c0_63 = arith.constant 0 : index
    %c0_64 = arith.constant 0 : index
    %104 = vector.load %arg18[%c0_62, %c0_63, %c0_64] : memref<2x8x32xf32, #tpu.memory_space<vmem>>, vector<2x8x32xf32>
    tpu.vector_store %arg18[%c0_62, %c0_63, %c0_64], %103 {strides = array<i32>} : memref<2x8x32xf32, #tpu.memory_space<vmem>>, vector<2x8x32xf32>,
    %c1_i32 = arith.constant 1 : i32
    %105 = arith.cmpi eq, %arg1, %c1_i32 : i32
    %106 = arith.extui %105 : i1 to i32
    %c0_i32_65 = arith.constant 0 : i32
    %107 = arith.cmpi ne, %106, %c0_i32_65 : i32
    scf.if %107 {
      %c0_66 = arith.constant 0 : index
      %c0_67 = arith.constant 0 : index
      %c0_68 = arith.constant 0 : index
      %108 = vector.load %arg17[%c0_66, %c0_67, %c0_68] : memref<2x8x32xf32, #tpu.memory_space<vmem>>, vector<2x8x32xf32>
      tpu.vector_store %arg17[%c0_66, %c0_67, %c0_68], %103 {strides = array<i32>} : memref<2x8x32xf32, #tpu.memory_space<vmem>>, vector<2x8x32xf32>,
    } else {
    }
    return
  }
  func.func @transform_0(%arg0: i32, %arg1: i32) -> (i32, i32, i32) {
    %c0_i32 = arith.constant 0 : i32
    %c0_i32_0 = arith.constant 0 : i32
    %c0_i32_1 = arith.constant 0 : i32
    return %arg0, %c0_i32, %c0_i32_0 : i32, i32, i32
  }
  func.func @transform_1(%arg0: i32, %arg1: i32) -> (i32, i32) {
    %c0_i32 = arith.constant 0 : i32
    %c0_i32_0 = arith.constant 0 : i32
    %c0_i32_1 = arith.constant 0 : i32
    return %c0_i32, %c0_i32_0 : i32, i32
  }
  func.func @transform_2(%arg0: i32, %arg1: i32) -> (i32, i32) {
    %c0_i32 = arith.constant 0 : i32
    %c0_i32_0 = arith.constant 0 : i32
    %c0_i32_1 = arith.constant 0 : i32
    return %c0_i32, %c0_i32_0 : i32, i32
  }
  func.func @transform_3(%arg0: i32, %arg1: i32) -> (i32, i32, i32) {
    %c0_i32 = arith.constant 0 : i32
    %c0_i32_0 = arith.constant 0 : i32
    %c0_i32_1 = arith.constant 0 : i32
    return %arg1, %c0_i32, %c0_i32_0 : i32, i32, i32
  }
  func.func @transform_4(%arg0: i32, %arg1: i32) -> (i32, i32, i32) {
    %c0_i32 = arith.constant 0 : i32
    %c0_i32_0 = arith.constant 0 : i32
    %c0_i32_1 = arith.constant 0 : i32
    return %arg1, %c0_i32, %c0_i32_0 : i32, i32, i32
  }
  func.func @transform_5(%arg0: i32, %arg1: i32) -> (i32, i32, i32) {
    %c0_i32 = arith.constant 0 : i32
    %c0_i32_0 = arith.constant 0 : i32
    %c0_i32_1 = arith.constant 0 : i32
    return %arg1, %c0_i32, %c0_i32_0 : i32, i32, i32
  }
  func.func @transform_6(%arg0: i32, %arg1: i32) -> (i32, i32, i32) {
    %c0_i32 = arith.constant 0 : i32
    %c0_i32_0 = arith.constant 0 : i32
    %c0_i32_1 = arith.constant 0 : i32
    return %arg1, %c0_i32, %c0_i32_0 : i32, i32, i32
  }
  func.func @transform_7(%arg0: i32, %arg1: i32) -> (i32, i32, i32) {
    %c0_i32 = arith.constant 0 : i32
    %c0_i32_0 = arith.constant 0 : i32
    %c0_i32_1 = arith.constant 0 : i32
    return %arg1, %c0_i32, %c0_i32_0 : i32, i32, i32
  }
  func.func @transform_8(%arg0: i32, %arg1: i32) -> (i32, i32, i32) {
    %c0_i32 = arith.constant 0 : i32
    %c0_i32_0 = arith.constant 0 : i32
    %c0_i32_1 = arith.constant 0 : i32
    return %arg1, %c0_i32, %c0_i32_0 : i32, i32, i32
  }
  func.func @transform_9(%arg0: i32, %arg1: i32) -> (i32, i32, i32) {
    %c0_i32 = arith.constant 0 : i32
    %c0_i32_0 = arith.constant 0 : i32
    %c0_i32_1 = arith.constant 0 : i32
    return %arg1, %c0_i32, %c0_i32_0 : i32, i32, i32
  }
  func.func @transform_10(%arg0: i32, %arg1: i32) -> (i32, i32, i32) {
    %c0_i32 = arith.constant 0 : i32
    %c0_i32_0 = arith.constant 0 : i32
    %c0_i32_1 = arith.constant 0 : i32
    return %arg1, %c0_i32, %c0_i32_0 : i32, i32, i32
  }
  func.func @transform_11(%arg0: i32, %arg1: i32) -> (i32, i32, i32) {
    %c0_i32 = arith.constant 0 : i32
    %c0_i32_0 = arith.constant 0 : i32
    %c0_i32_1 = arith.constant 0 : i32
    return %arg1, %c0_i32, %c0_i32_0 : i32, i32, i32
  }
  func.func @transform_12(%arg0: i32, %arg1: i32) -> (i32, i32, i32) {
    %c0_i32 = arith.constant 0 : i32
    %c0_i32_0 = arith.constant 0 : i32
    %c0_i32_1 = arith.constant 0 : i32
    return %arg1, %c0_i32, %c0_i32_0 : i32, i32, i32
  }
  func.func @transform_13(%arg0: i32, %arg1: i32) -> (i32, i32, i32) {
    %c0_i32 = arith.constant 0 : i32
    %c0_i32_0 = arith.constant 0 : i32
    %c0_i32_1 = arith.constant 0 : i32
    return %arg1, %c0_i32, %c0_i32_0 : i32, i32, i32
  }
  func.func @transform_14(%arg0: i32, %arg1: i32) -> (i32, i32, i32) {
    %c0_i32 = arith.constant 0 : i32
    %c0_i32_0 = arith.constant 0 : i32
    %c0_i32_1 = arith.constant 0 : i32
    return %arg1, %c0_i32, %c0_i32_0 : i32, i32, i32
  }
  func.func @transform_15(%arg0: i32, %arg1: i32) -> (i32, i32, i32) {
    %c0_i32 = arith.constant 0 : i32
    %c0_i32_0 = arith.constant 0 : i32
    %c0_i32_1 = arith.constant 0 : i32
    return %arg0, %c0_i32, %c0_i32_0 : i32, i32, i32
  }
}

</mosaic_0001>

<bundles_post_ra>
// kernel: tpu_custom_call.1
= control target key start
LH: loop header
LB: loop body
LE: loop exit
PB: predicated region body
PF: predicated region fallthrough
CT: control target
= control target key end

     0   :  { %s2846_s0 = inlined_call_operand.vmem [shape: f32[2,8,4], index: 0, kind: input, shape index: {}]   ;;  %s2847_s1 = inlined_call_operand.vmem [shape: bf16[4,32], index: 1, kind: input, shape index: {}]   ;;  %s2848_s2 = inlined_call_operand.hbm [shape: f32[1,32], index: 2, kind: input, shape index: {}]   ;;  %s2849_s3 = inlined_call_operand.vmem [shape: f32[2,1,32], index: 3, kind: input, shape index: {}]   ;;  %s2850_s4 = inlined_call_operand.hbm [shape: f32[2,1,32], index: 4, kind: input, shape index: {}]   ;;  %s2851_s5 = inlined_call_operand.vmem [shape: bf16[2,8,8], index: 5, kind: input, shape index: {}]   ;;  %s2852_s6 = inlined_call_operand.hbm [shape: f32[2,1,8], index: 6, kind: input, shape index: {}]   ;;  %s2853_s7 = inlined_call_operand.hbm [shape: bf16[2,8,8], index: 7, kind: input, shape index: {}]   ;;  %s2854_s8 = inlined_call_operand.hbm [shape: f32[2,1,8], index: 8, kind: input, shape index: {}]   ;;  %s2855_s9 = inlined_call_operand.hbm [shape: f32[2,1,32], index: 9, kind: input, shape index: {}]   ;;  %s2856_s10 = inlined_call_operand.hbm [shape: f32[2,1,32], index: 10, kind: input, shape index: {}]   ;;  %s2857_s11 = inlined_call_operand.vmem [shape: bf16[2,32,32], index: 11, kind: input, shape index: {}]   ;;  %s2858_s12 = inlined_call_operand.hbm [shape: f32[2,1,32], index: 12, kind: input, shape index: {}]   ;;  %s2859_s13 = inlined_call_operand.hbm [shape: bf16[2,32,32], index: 13, kind: input, shape index: {}]   ;;  %s2860_s14 = inlined_call_operand.vmem [shape: f32[2,1,32], index: 14, kind: input, shape index: {}]   ;;  %s2861_s15 = inlined_call_operand.hbm [shape: f32[2,8,32], index: 15, kind: output, shape index: {}]  }
   0x1   :  { %2869 = sst [smem:[#allocation29_spill]] %s2846_s0 }
   0x2   :  { %2870 = sst [smem:[#allocation30_spill]] %s2847_s1 }
   0x3   :  { %2871 = sst [smem:[#allocation31_spill]] %s2848_s2 }
   0x4   :  { %2872 = sst [smem:[#allocation32_spill]] %s2849_s3 }
   0x5   :  { %2873 = sst [smem:[#allocation33_spill]] %s2850_s4 }
   0x6   :  { %2874 = sst [smem:[#allocation34_spill]] %s2851_s5 }
   0x7   :  { %2875 = sst [smem:[#allocation35_spill]] %s2852_s6 }
   0x8   :  { %2876 = sst [smem:[#allocation36_spill]] %s2853_s7 }
   0x9   :  { %2877 = sst [smem:[#allocation37_spill]] %s2857_s11 }
   0xa   :  { %2878 = sst [smem:[#allocation38_spill]] %s2859_s13 }
   0xb   :  { %2879 = sst [smem:[#allocation39_spill]] %s2860_s14 }
   0xc   :  { %2880 = sst [smem:[#allocation40_spill]] %s2861_s15 }
   0xd   :  { %20 = vsyncpa [#allocation4], 0 }
   0xe   :  { %21 = vsyncpa [#allocation7], 0 }
   0xf   :  { %23 = vsyncpa [#allocation7 + $0x1], 0 }
  0x10   :  { %24 = vsyncpa [#allocation10], 0 }
  0x11   :  { %26 = vsyncpa [#allocation10 + $0x1], 0 }
  0x12   :  { %27 = vsyncpa [#allocation13], 0 }
  0x13   :  { %29 = vsyncpa [#allocation13 + $0x1], 0 }
  0x14   :  { %30 = vsyncpa [#allocation16], 0 }
  0x15   :  { %32 = vsyncpa [#allocation16 + $0x1], 0 }
  0x16   :  { %33 = vsyncpa [#allocation5], 0  ;;  %s2472_s18 = smov 0   ;;  %s2474_s19 = smov 0  }
  0x17   :  { %s2476_s20 = smov 0   ;;  %s2478_s21 = smov 0  }
  0x18   :  { %s2480_s22 = smov 0   ;;  %s2482_s23 = smov 0  }
  0x19 LB: > { %2881 = sst [smem:[#allocation25_spill]] %s2360_s20  ;;  %s48_s24 = sadd.s32 1, %s2368_s22  ;;  %s2372_s23 = sphi %s2482_s23, %s39_s23   ;;  %s2368_s22 = sphi %s2480_s22, %s2924_s22   ;;  %s2364_s21 = sphi %s2478_s21, %s2923_s21   ;;  %s2360_s20 = sphi %s2476_s20, %s2919_s20   ;;  %s2356_s19 = sphi %s2474_s19, %s2922_s19   ;;  %s2352_s18 = sphi %s2472_s18, %s2921_s18  }
  0x1a   : > { %2882 = sst [smem:[#allocation26_spill]] %s2364_s21  ;;  %s152_s25 = sadd.s32 1, %s2360_s20 }
  0x1b   : > { %p49_p0 = scmp.ge.s32.totalorder %s48_s24, 2  ;;  %p159_p1 = scmp.ne.s32.totalorder %s2360_s20, %s2356_s19 }
  0x1c   : > { %p160_p2 = scmp.eq.s32.totalorder %s2372_s23, 0  ;;  %p1954_p4 = scmp.lt.s32.totalorder %s2372_s23, 2 }
  0x1d   : > { %s2926_s24 = smov (%p49_p0, %s48_s24), 0  ;;  %s2513_s27 = sand.u32 1, %s2372_s23  }
  0x1e   : > { %2883 = sst [smem:[#allocation27_spill]] %s2926_s24  ;;  %p161_p3 = por %p160_p2, %p159_p1 }
  0x1f   : > { %s149_s26 = ssub.s32 %s2368_s22, %s2926_s24  ;;  %s2516_s28 = sand.u32 1, %s2360_s20  }
  0x20   : > { %p150_p5 = scmp.eq.s32.totalorder %s149_s26, 0  ;;  %s2519_s29 = sshll.u32 %s2368_s22, 4 }
  0x21   : > { %s2885_s4 = sld [smem:[#allocation33_spill]]  ;;  %s507_s0 = scalar_lea.vmem [#allocation6], %s2516_s28 }
  0x22   : > { %s2522_s30 = scalar_select %p150_p5, %s2360_s20, %s152_s25  }
  0x23   : > { %s514_s1 = sshll.u32 %s507_s0, 4  ;;  %p2529_p6 = pnand %p1954_p4, %p161_p3  ;;  %s515_s1 = int_to_ptr.vmem [resolvable:$true] %s514_s1 }
  0x24   : > { %2884 = sst [smem:[#allocation28_spill]] %s2522_s30  ;;  %s1790_s26 = sshll.u32 %s2516_s28, 2 }
  0x25   : > { %s505_s14 = scalar_lea.sflag [#allocation7], %s2513_s27  ;;  %p2537_p7 = pneg %p2529_p6 }
  0x26   : > { %s2041_s25 = scalar_lea.vmem %s515_s1, 16  ;;  %s2374_s0 = smov [#allocation6]  }
  0x27   : > { %s512_s15 = scalar_lea.hbm %s2885_s4, %s2519_s29  ;;  %p2042_p8 = scmp.ne.s32.totalorder %s515_s1, %s2041_s25 }
  0x28   : > { %s2046_s16 = sshll.u32 %s2374_s0, 4  ;;  %s2047_s16 = int_to_ptr.vmem [resolvable:$false] %s2046_s16 }
  0x29   : > { %p2044_p9 = pnand %p2042_p8, %p2537_p7  ;;  %s2048_s17 = scalar_lea.vmem %s2047_s16, 32 }
  0x2a   : > { %p2049_p11 = scmp.lt.s32.totalorder %s515_s1, %s2047_s16  ;;  %p2050_p12 = scmp.lt.s32.totalorder %s2048_s17, %s2041_s25 }
  0x2b   : > { %p2045_p10 = pneg %p2044_p9 }
  0x2c   : > { %p2051_p13 = por %p2050_p12, %p2049_p11 }
  0x2e   : > { %p2052_p0 = pnand %p2051_p13, %p2045_p10 }
  0x30   : > { %2055 = shalt.err (!%p2052_p0)
}
  0x31   : > { %1931 = dma.hbm_to_vmem [thread:$0]  (!%p2529_p6), %s512_s15, 16, %s515_s1, %s505_s14  }
  0x32   : > { %s1791_s4 = sshll.u32 %s2368_s22, 6  ;;  %s2888_s7 = sld [smem:[#allocation36_spill]] }
  0x33   : > { %s549_s5 = scalar_lea.vmem [#allocation9], %s1790_s26  ;;  %s546_s25 = scalar_lea.sflag [#allocation10], %s2513_s27 }
  0x34   : > { %s556_s3 = sshll.u32 %s549_s5, 4  ;;  %s2375_s17 = smov [#allocation9]   ;;  %s557_s3 = int_to_ptr.vmem [resolvable:$true] %s556_s3 }
  0x35   : > { %s2069_s16 = scalar_lea.vmem %s557_s3, 64  ;;  %s2074_s21 = sshll.u32 %s2375_s17, 4  ;;  %s2075_s21 = int_to_ptr.vmem [resolvable:$false] %s2074_s21 }
  0x36   : > { %p2070_p1 = scmp.ne.s32.totalorder %s557_s3, %s2069_s16  ;;  %s2076_s13 = scalar_lea.vmem %s2075_s21, 128 }
  0x37   : > { %p2077_p4 = scmp.lt.s32.totalorder %s557_s3, %s2075_s21  ;;  %p2078_p5 = scmp.lt.s32.totalorder %s2076_s13, %s2069_s16 }
  0x38   : > { %s554_s0 = scalar_lea.hbm %s2888_s7, %s1791_s4  ;;  %p2072_p2 = pnand %p2070_p1, %p2537_p7 }
  0x39   : > { %p2079_p8 = por %p2078_p5, %p2077_p4 }
  0x3a   : > { %p2073_p3 = pneg %p2072_p2 }
  0x3c   : > { %p2080_p9 = pnand %p2079_p8, %p2073_p3 }
  0x3e   : > { %2083 = shalt.err (!%p2080_p9)
}
  0x3f   : > { %1937 = dma.hbm_to_vmem [thread:$0]  (!%p2529_p6), %s554_s0, 64, %s557_s3, %s546_s25  }
  0x40   : > { %s588_s5 = scalar_lea.hbm %s2855_s9, %s2519_s29  ;;  %s583_s15 = scalar_lea.vmem [#allocation12], %s2516_s28 }
  0x41   : > { %s590_s20 = sshll.u32 %s583_s15, 4  ;;  %s2867_s13 = scalar_lea.sflag [#allocation13], %s2513_s27  ;;  %s591_s20 = int_to_ptr.vmem [resolvable:$true] %s590_s20 }
  0x42   : > { %s2097_s21 = scalar_lea.vmem %s591_s20, 16  ;;  %s2376_s30 = smov [#allocation12]  }
  0x43   : > { %p2098_p10 = scmp.ne.s32.totalorder %s591_s20, %s2097_s21  ;;  %s2102_s26 = sshll.u32 %s2376_s30, 4  ;;  %s2103_s26 = int_to_ptr.vmem [resolvable:$false] %s2102_s26 }
  0x44   : > { %s2104_s16 = scalar_lea.vmem %s2103_s26, 32  ;;  %p2105_p13 = scmp.lt.s32.totalorder %s591_s20, %s2103_s26 }
  0x45   : > { %p2100_p11 = pnand %p2098_p10, %p2537_p7  ;;  %p2106_p0 = scmp.lt.s32.totalorder %s2104_s16, %s2097_s21 }
  0x47   : > { %p2101_p12 = pneg %p2100_p11  ;;  %p2107_p1 = por %p2106_p0, %p2105_p13 }
  0x49   : > { %p2108_p2 = pnand %p2107_p1, %p2101_p12 }
  0x4b   : > { %2111 = shalt.err (!%p2108_p2)
}
  0x4c   : > { %1943 = dma.hbm_to_vmem [thread:$0]  (!%p2529_p6), %s588_s5, 16, %s591_s20, %s2867_s13  }
  0x4d   : > { %s630_s17 = scalar_lea.hbm %s2858_s12, %s2519_s29  ;;  %s625_s1 = scalar_lea.vmem [#allocation15], %s2516_s28 }
  0x4e   : > { %s632_s4 = sshll.u32 %s625_s1, 4  ;;  %s2866_s15 = scalar_lea.sflag [#allocation16], %s2513_s27  ;;  %s633_s4 = int_to_ptr.vmem [resolvable:$true] %s632_s4 }
  0x4f   : > { %s2125_s21 = scalar_lea.vmem %s633_s4, 16  ;;  %s2377_s30 = smov [#allocation15]  }
  0x50   : > { %p2126_p3 = scmp.ne.s32.totalorder %s633_s4, %s2125_s21  ;;  %s2130_s26 = sshll.u32 %s2377_s30, 4  ;;  %s2131_s26 = int_to_ptr.vmem [resolvable:$false] %s2130_s26 }
  0x51   : > { %s2132_s16 = scalar_lea.vmem %s2131_s26, 32  ;;  %p2133_p8 = scmp.lt.s32.totalorder %s633_s4, %s2131_s26 }
  0x52   : > { %p2128_p4 = pnand %p2126_p3, %p2537_p7  ;;  %p2134_p9 = scmp.lt.s32.totalorder %s2132_s16, %s2125_s21 }
  0x54   : > { %p2129_p5 = pneg %p2128_p4  ;;  %p2135_p10 = por %p2134_p9, %p2133_p8 }
  0x56   : > { %p2136_p11 = pnand %p2135_p10, %p2129_p5 }
  0x58   : > { %2139 = shalt.err (!%p2136_p11)
}
  0x59   : > { %1949 = dma.hbm_to_vmem [thread:$0]  (!%p2529_p6), %s630_s17, 16, %s633_s4, %s2866_s15  }
  0x5a   : > { %s2583_s5 = sadd.s32 4294967295, %s2372_s23   ;;  %p165_p12 = scmp.ne.s32.totalorder %s2356_s19, %s2352_s18 }
  0x5b   : > { %p2868_p13 = scmp.eq.s32.totalorder %s2583_s5, 0  ;;  %p1784_p0 = scmp.ge.s32.totalorder %s2372_s23, 1 }
  0x5c   : > { %p462_p1 = scmp.lt.s32.totalorder %s2372_s23, 3  ;;  %s2378_s0 = smov [#allocation3]  }
  0x5d   : > { %p2592_p2 = por %p2868_p13, %p165_p12  ;;  %s487_s17 = sshll.u32 %s2378_s0, 4  ;;  %s2602_s17 = int_to_ptr.vmem [resolvable:$true] %s487_s17 }
  0x5e   : > { %p2596_p3 = pnand %p1784_p0, %p462_p1  ;;  %s2891_s6 = sld [smem:[#allocation35_spill]] }
  0x5f   : > { %s531_s21 = scalar_lea.vmem [#allocation8], %s2516_s28  ;;  %s2379_s0 = smov [#allocation8]  }
  0x60   : > { %p1924_p4 = pneg %p2596_p3  ;;  %s538_s30 = sshll.u32 %s531_s21, 4  ;;  %s539_s30 = int_to_ptr.vmem [resolvable:$true] %s538_s30 }
  0x61   : > { %s2153_s16 = scalar_lea.vmem %s539_s30, 16  ;;  %s2158_s15 = sshll.u32 %s2379_s0, 4  ;;  %s2159_s15 = int_to_ptr.vmem [resolvable:$false] %s2158_s15 }
  0x62   : > { %p2611_p5 = pnand %p1924_p4, %p2868_p13  ;;  %p2154_p8 = scmp.ne.s32.totalorder %s539_s30, %s2153_s16 }
  0x63   : > { %s2160_s13 = scalar_lea.vmem %s2159_s15, 32  ;;  %p2161_p11 = scmp.lt.s32.totalorder %s539_s30, %s2159_s15 }
  0x64   : > { %s536_s4 = scalar_lea.hbm %s2891_s6, %s2519_s29  ;;  %p2156_p9 = pnand %p2154_p8, %p2537_p7 }
  0x65   : > { %p2162_p12 = scmp.lt.s32.totalorder %s2160_s13, %s2153_s16 }
  0x66   : > { %p2157_p10 = pneg %p2156_p9 }
  0x67   : > { %p2163_p0 = por %p2162_p12, %p2161_p11 }
  0x69   : > { %p2164_p1 = pnand %p2163_p0, %p2157_p10 }
  0x6b   : > { %2167 = shalt.err (!%p2164_p1)
}
  0x6c   : > { %1934 = dma.hbm_to_vmem [thread:$0]  (!%p2529_p6), %s536_s4, 16, %s539_s30, %s505_s14  }
  0x6d   : > { %p2170_p4 = pneg %p2611_p5  ;;  %s2179_s18 = scalar_lea.vmem %s2602_s17, 16 }
  0x6e   : > { %p2180_p8 = scmp.ne.s32.totalorder %s2602_s17, %s2179_s18  ;;  %s2186_s13 = scalar_lea.vmem %s2602_s17, 32 }
  0x6f   : > { %p2187_p10 = scmp.lt.s32.totalorder %s2602_s17, %s2602_s17  ;;  %p2188_p11 = scmp.lt.s32.totalorder %s2186_s13, %s2179_s18 }
  0x70   : > { %p2182_p9 = pnand %p2180_p8, %p2170_p4 }
  0x71   : > { %p2189_p12 = por %p2188_p11, %p2187_p10 }
  0x72   : > { %p2183_p13 = pneg %p2182_p9 }
  0x74   : > { %p2190_p0 = pnand %p2189_p12, %p2183_p13 }
  0x76   : > { %2193 = shalt.err (!%p2190_p0)
}
  0x77   : > { %s2893_s2 = sld [smem:[#allocation31_spill]]  ;;  %s571_s21 = scalar_lea.hbm %s2854_s8, %s2519_s29 }
  0x78   : > { %s566_s30 = scalar_lea.vmem [#allocation11], %s2516_s28  ;;  %s2380_s26 = smov [#allocation11]  }
  0x79   : > { %s573_s16 = sshll.u32 %s566_s30, 4  ;;  %s2212_s18 = sshll.u32 %s2380_s26, 4  ;;  %s574_s16 = int_to_ptr.vmem [resolvable:$true] %s573_s16  ;;  %s2213_s18 = int_to_ptr.vmem [resolvable:$false] %s2212_s18 }
  0x7a   : > { %s2207_s0 = scalar_lea.vmem %s574_s16, 16  ;;  %s2214_s13 = scalar_lea.vmem %s2213_s18, 32 }
  0x7b   : > { %p2208_p13 = scmp.ne.s32.totalorder %s574_s16, %s2207_s0  ;;  %p2215_p8 = scmp.lt.s32.totalorder %s574_s16, %s2213_s18 }
  0x7c   : > { %p2216_p9 = scmp.lt.s32.totalorder %s2214_s13, %s2207_s0 }
  0x7d   : > { %1927 = dma.hbm_to_vmem [thread:$0]  (!%p2611_p5), %s2893_s2, 16, %s2602_s17, [#allocation4]  }
  0x7e   : > { %p2210_p1 = pnand %p2208_p13, %p2537_p7  ;;  %p2217_p10 = por %p2216_p9, %p2215_p8 }
  0x80   : > { %p2211_p4 = pneg %p2210_p1 }
  0x82   : > { %p2218_p5 = pnand %p2217_p10, %p2211_p4 }
  0x84   : > { %2221 = shalt.err (!%p2218_p5)
}
  0x85   : > { %1940 = dma.hbm_to_vmem [thread:$0]  (!%p2529_p6), %s571_s21, 16, %s574_s16, %s546_s25  }
  0x86   : > { %s605_s1 = scalar_lea.hbm %s2856_s10, %s2519_s29  ;;  %s600_s14 = scalar_lea.vmem [#allocation14], %s2516_s28 }
  0x87   : > { %s607_s4 = sshll.u32 %s600_s14, 4  ;;  %s1796_s30 = sshll.u32 %s2516_s28, 4  ;;  %s608_s4 = int_to_ptr.vmem [resolvable:$true] %s607_s4 }
  0x88   : > { %s2235_s0 = scalar_lea.vmem %s608_s4, 16  ;;  %s2381_s26 = smov [#allocation14]  }
  0x89   : > { %p2236_p11 = scmp.ne.s32.totalorder %s608_s4, %s2235_s0  ;;  %s2240_s18 = sshll.u32 %s2381_s26, 4  ;;  %s2241_s18 = int_to_ptr.vmem [resolvable:$false] %s2240_s18 }
  0x8a   : > { %s2242_s13 = scalar_lea.vmem %s2241_s18, 32  ;;  %p2243_p13 = scmp.lt.s32.totalorder %s608_s4, %s2241_s18 }
  0x8b   : > { %p2238_p12 = pnand %p2236_p11, %p2537_p7  ;;  %p2244_p1 = scmp.lt.s32.totalorder %s2242_s13, %s2235_s0 }
  0x8d   : > { %p2239_p0 = pneg %p2238_p12  ;;  %p2245_p4 = por %p2244_p1, %p2243_p13 }
  0x8f   : > { %p2246_p8 = pnand %p2245_p4, %p2239_p0 }
  0x91   : > { %2249 = shalt.err (!%p2246_p8)
}
  0x92   : > { %s2894_s29 = scalar_lea.sflag [#allocation13], %s2513_s27  ;;  %s1836_s28 = sshll.u32 %s2368_s22, 8 }
  0x93   : > { %1946 = dma.hbm_to_vmem [thread:$0]  (!%p2529_p6), %s605_s1, 16, %s608_s4, %s2894_s29  }
  0x94   : > { %s2895_s16 = sld [smem:[#allocation38_spill]]  ;;  %s643_s15 = scalar_lea.vmem [#allocation17], %s1796_s30 }
  0x95   : > { %s650_s14 = sshll.u32 %s643_s15, 4  ;;  %s2382_s0 = smov [#allocation17]   ;;  %s651_s14 = int_to_ptr.vmem [resolvable:$true] %s650_s14 }
  0x96   : > { %s2263_s26 = scalar_lea.vmem %s651_s14, 256  ;;  %s2268_s18 = sshll.u32 %s2382_s0, 4  ;;  %s2269_s18 = int_to_ptr.vmem [resolvable:$false] %s2268_s18 }
  0x97   : > { %p2264_p9 = scmp.ne.s32.totalorder %s651_s14, %s2263_s26  ;;  %s2270_s13 = scalar_lea.vmem %s2269_s18, 512 }
  0x98   : > { %p2271_p11 = scmp.lt.s32.totalorder %s651_s14, %s2269_s18  ;;  %p2272_p12 = scmp.lt.s32.totalorder %s2270_s13, %s2263_s26 }
  0x99   : > { %p2266_p10 = pnand %p2264_p9, %p2537_p7 }
  0x9a   : > { %s649_s17 = scalar_lea.hbm %s2895_s16, %s1836_s28  ;;  %p2273_p0 = por %p2272_p12, %p2271_p11 }
  0x9b   : > { %p2267_p5 = pneg %p2266_p10 }
  0x9d   : > { %p2274_p13 = pnand %p2273_p0, %p2267_p5 }
  0x9f   : > { %2277 = shalt.err (!%p2274_p13)
}
  0xa0   : > { %s2383_s1 = smov 64   ;;  %s2384_s4 = smov 4  }
  0xa1   : > { %s2896_s30 = scalar_lea.sflag [#allocation16], %s2513_s27  ;;  %668 = sbr.rel (%p2596_p3) target bundleno = 2138 (0x85a), region = 80 }
  0xa2   : > { %1952 = dma.hbm_to_vmem [thread:$0]  (!%p2529_p6), %s649_s17, 256, %s651_s14, %s2896_s30, %s2383_s1, %s2383_s1, %s2384_s4  }
  0xa3   : > { %p2897_p7 = scmp.eq.s32.totalorder (!%p2596_p3), %s2583_s5, 0 }
  0xa6   : > { %2327 = dma.done.wait (%p2897_p7), [#allocation4], 16   ;;  %p2898_p1 = pmov %p2897_p7 }
  0xa7   : > { %s674_s11 = sand.u32 1, %s2583_s5   ;;  %s2675_s29 = sand.u32 1, %s2356_s19  }
  0xa8   : > { %2329 = vsyncadd (%p2898_p1), [#allocation4], 4294967280  ;;  %s675_s28 = scalar_lea.sflag [#allocation7], %s674_s11 }
  0xa9   : > { %2331 = dma.done.wait (%p2592_p2), %s675_s28, 32  }
  0xaa   : > { %2333 = vsyncadd (%p2592_p2), %s675_s28, 4294967264  ;;  %s1801_s27 = sshll.u32 %s2675_s29, 2  ;;  %s691_s25 = scalar_lea.sflag [#allocation10], %s674_s11 }
  0xab   : > { %s2684_s21 = scalar_lea.vmem [#allocation9], %s1801_s27 }
  0xac   : > { %2335 = dma.done.wait (%p2592_p2), %s691_s25, 80  }
  0xad   : > { %2337 = vsyncadd (%p2592_p2), %s691_s25, 4294967216  ;;  %s708_s17 = scalar_lea.sflag [#allocation13], %s674_s11 }
  0xae   : > { %2339 = dma.done.wait (%p2592_p2), %s708_s17, 32  }
  0xaf   : > { %2341 = vsyncadd (%p2592_p2), %s708_s17, 4294967264  ;;  %s724_s26 = scalar_lea.sflag [#allocation16], %s674_s11 }
  0xb0   : > { %2343 = dma.done.wait (%p2592_p2), %s724_s26, 272  }
  0xb1   : > { %2345 = vsyncadd (%p2592_p2), %s724_s26, 4294967024  ;;  %s2899_s18 = sld [smem:[#allocation26_spill]]  ;;  %s1802_s13 = sshll.u32 %s2675_s29, 4 }
  0xb2   : > { %s2901_s20 = sld [smem:[#allocation34_spill]]  ;;  %s2727_s30 = scalar_lea.vmem [#allocation17], %s1802_s13 }
  0xb3   : > { %s2902_s16 = sld [smem:[#allocation37_spill]] }
  0xb4   : > { %s2903_s6 = sld [smem:[#allocation39_spill]] }
  0xb7   : > { %p832_p6 = scmp.lt.s32.totalorder %s2899_s18, 1  ;;  %p1806_p2 = scmp.ne.s32.totalorder %s2899_s18, 0 }
  0xb8   : > { %s2904_s25 = sld [smem:[#allocation30_spill]] (!%p1806_p2) }
  0xb9   : > { %s2705_s1 = scalar_select %p832_p6, %s2899_s18, 1 }
  0xba   : > { %852 = sbr.rel (%p1806_p2) target bundleno = 402 (0x192), region = 120 }
  0xbb   : > { %s1803_s27 = sshll.u32 %s2705_s1, 2  ;;  %s1837_s0 = sshll.u32 %s2705_s1, 4 }
  0xbc   : > { %s2715_s26 = scalar_lea.vmem %s2901_s20, %s1803_s27  ;;  %s2721_s3 = scalar_lea.vmem %s2902_s16, %s1837_s0 }
  0xbd   : > { %s846_s4 = scalar_lea.vmem %s2903_s6, %s2705_s1  ;;  %s2905_s20 = sld [smem:[#allocation29_spill]] (!%p1806_p2) }
  0xbf   : > { %v856_v0 = vld [vmem:[%s2904_s25] sm:$0x3]  ;;  %vm868_vm0 = vcmask 1041408   ;;  %v2385_v2 = vmov 0.0   ;;  %vm2386_vm1 = vmmov 0   ;;  %vm864_vm2 = vcmask 31744  }
  0xc0   : > { %1856 = vmatprep.subr.bf16.mxu0 %v2385_v2  ;;  %v870_v3 = vsel %vm868_vm0, %v856_v0, 0  ;;  %1858 = vmatprep.mubr.msk.bf16.mxu0 %vm2386_vm1, %v2385_v2  ;;  %v1807_v6 = vld [vmem:[#allocation3] ss:$0 sm:$0xff]  ;;  %vm919_vm4 = vcmask 261120  }
  0xc1   : > { %1857 = vmatpush3.bf16.msra.mxu0 %v870_v3 }
  0xc3   : > { %s2906_s7 = smov %s2905_s20  ;;  %v853_v1 = vld [vmem:[%s2905_s20] sm:$0xff] }
  0xc4   : > { %v854_v4 = vld [vmem:[%s2906_s7 + $0x8] sm:$0xff] }
  0xc5   : > { %v855_v5 = vpack.c.bf16 %v854_v4, %v853_v1 }
  0xc7   : > { %1859 = vmatmul.mubr.msk.bf16.vlgmr.msra.gmra.mxu0 %vm864_vm2, %v855_v5 }
 0x187   : > { %v906_v7 = vpop.f32.mrf.mxu0 }
 0x188   : > { %v907_v8 = vadd.f32 %v1807_v6, %v906_v7 }
 0x189   : > { %v1860_v9 = vpop.f32.mrf.mxu0 }
 0x18a   : > { %vm913_vm3 = vcmp.ge.f32.partialorder %v907_v8, 0.0  ;;  %v915_v10 = vmul.f32 0.2, %v907_v8 }
 0x18b   : > { %v909_v11 = vpop.f32.mrf.mxu0 }
 0x18c   : > { %v917_v12 = vsel %vm913_vm3, %v907_v8, %v915_v10  ;;  %v910_v13 = vadd.f32 %v1807_v6, %v909_v11 }
 0x18d   : > { %920 = vst.msk [vmem:[#allocation2] sm:$0xff] %vm919_vm4, %v917_v12  ;;  %v1861_v14 = vpop.f32.mrf.mxu0 }
 0x18e   : > { %vm914_vm5 = vcmp.ge.f32.partialorder %v910_v13, 0.0  ;;  %v916_v15 = vmul.f32 0.2, %v910_v13 }
 0x190   : > { %v918_v16 = vsel %vm914_vm5, %v910_v13, %v916_v15 }
 0x191   : > { %921 = vst.msk [vmem:[#allocation2 + $0x8] sm:$0xff] %vm919_vm4, %v918_v16 }
 0x192 PF: > { %vm926_vm6 = vcmask 261120   ;;  %s2907_s15 = sld [smem:[#allocation32_spill]]  ;;  %s2909_s0 = scalar_lea.vmem [#allocation6], %s2675_s29  ;;  %v1038_v47 = vld [vmem:[%s2715_s26] sm:$0xf]  ;;  %vm1059_vm7 = vcmask 1043456  }
 0x193   : > { %v1810_v40 = vld [vmem:[%s2909_s0] ss:$0 sm:$0xff]  ;;  %1898 = vmatprep.subr.msk.bf16.mxu0 %vm1059_vm7, %v1038_v47  ;;  %v1061_v48 = vsel %vm1059_vm7, %v1038_v47, 0  ;;  %vm1046_vm8 = vcmask 64512   ;;  %v1156_v61 = vld [vmem:[%s2684_s21] sm:$0xf] }
 0x194   : > { %v2739_v17 = vld [vmem:[#allocation2] sm:$0xff]  ;;  %1863 = vmatpush3.bf16.msra.mxu0 %v1061_v48  ;;  %1899 = vmatprep.subr.msk.bf16.mxu1 %vm1059_vm7, %v1156_v61  ;;  %v1177_v62 = vsel %vm1059_vm7, %v1156_v61, 0  ;;  %s2910_s18 = scalar_lea.vmem [#allocation8], %s2675_s29  ;;  %s2911_s21 = scalar_lea.vmem [#allocation11], %s2675_s29  ;;  %vm2388_vm1 = vmmov 0  }
 0x195   : > { %v927_v19 = vsel %vm926_vm6, %v2739_v17, 0.0  ;;  %1873 = vmatpush3.bf16.msra.mxu1 %v1177_v62  ;;  %v1811_v0 = vld [vmem:[%s2910_s18] ss:$0 sm:$0xff]  ;;  %s2913_s13 = scalar_lea.vmem [#allocation14], %s2675_s29  ;;  %s2914_s11 = scalar_lea.vmem [#allocation15], %s2675_s29 }
 0x196   : > { %928 = vadd.xlane.f32.xlu0 %v927_v19  ;;  %s2916_s28 = sld [smem:[#allocation26_spill]] }
 0x198   : > { %v2741_v18 = vld [vmem:[#allocation2 + $0x8] sm:$0xff]  ;;  %s2908_s14 = scalar_lea.vmem %s2907_s15, %s2705_s1 }
 0x199   : > { %v930_v20 = vsel %vm926_vm6, %v2741_v18, 0.0  ;;  %v1809_v38 = vld [vmem:[%s2908_s14] ss:$0 sm:$0xff] }
 0x19a   : > { %931 = vadd.xlane.f32.xlu0 %v930_v20 }
 0x19c   : > { %p1831_p3 = scmp.ne.s32.totalorder %s2916_s28, 1 }
 0x21f   : > { %v929_v21 = vpop.xlane.xlu0 %928 }
 0x220   : > { %v934_v22 = vmul.f32 0.03125, %v929_v21 }
 0x222   : > { %v936_v23 = vsub.f32 %v2739_v17, %v934_v22 }
 0x223   : > { %v932_v24 = vpop.xlane.xlu0 %931 }
 0x224   : > { %v935_v25 = vmul.f32 0.03125, %v932_v24  ;;  %v938_v26 = vmul.f32 %v936_v23, %v936_v23 }
 0x226   : > { %v937_v27 = vsub.f32 %v2741_v18, %v935_v25  ;;  %v940_v28 = vsel %vm926_vm6, %v938_v26, 0.0 }
 0x227   : > { %941 = vadd.xlane.f32.xlu1 %v940_v28 }
 0x228   : > { %v939_v29 = vmul.f32 %v937_v27, %v937_v27 }
 0x22a   : > { %v943_v30 = vsel %vm926_vm6, %v939_v29, 0.0 }
 0x22b   : > { %944 = vadd.xlane.f32.xlu1 %v943_v30 }
 0x2b0   : > { %v942_v31 = vpop.xlane.xlu1 %941 }
 0x2b1   : > { %v946_v32 = vmul.f32 0.03125, %v942_v31 }
 0x2b3   : > { %v948_v33 = vadd.f32 1e-05, %v946_v32 }
 0x2b4   : > { %v945_v34 = vpop.xlane.xlu1 %944 }
 0x2b5   : > { %2020 = vrsqrt.f32 %v948_v33  ;;  %v947_v35 = vmul.f32 0.03125, %v945_v34 }
 0x2b7   : > { %v949_v36 = vadd.f32 1e-05, %v947_v35 }
 0x2b9   : > { %2022 = vrsqrt.f32 %v949_v36 }
 0x2c2   : > { %v2021_v37 = vpop.eup %2020 }
 0x2c3   : > { %v952_v39 = vmul.f32 %v2021_v37, %v936_v23 }
 0x2c5   : > { %v960_v41 = vmul.f32 %v1809_v38, %v952_v39  ;;  %v1816_v39 = vld [vmem:[%s2911_s21] ss:$0 sm:$0xff] }
 0x2c6   : > { %v2023_v42 = vpop.eup %2022 }
 0x2c7   : > { %v968_v43 = vadd.f32 %v1810_v40, %v960_v41  ;;  %v953_v44 = vmul.f32 %v2023_v42, %v937_v27 }
 0x2c9   : > { %970 = vxpose.xlu0.b32.start.end [1/1] (short) (narrow) %v968_v43, 32  ;;  %v961_v45 = vmul.f32 %v1809_v38, %v953_v44 }
 0x2cb   : > { %v969_v46 = vadd.f32 %v1810_v40, %v961_v45 }
 0x2cd   : > { %1002 = vxpose.xlu1.b32.start.end [1/1] (short) (narrow) %v969_v46, 32 }
 0x345   : > { %v986_v49 = vpop.trf.xlu0 }
 0x349   : > { %v1018_v50 = vpop.trf.xlu1  ;;  %v987_v51 = vpop.trf.xlu0 }
 0x34a   : > { %v1034_v52 = vpack.c.bf16 %v987_v51, %v986_v49 }
 0x34c   : > { %1864 = vmatprep.mubr.msk.bf16.mxu0 %vm1046_vm8, %v1034_v52 }
 0x34d   : > { %v1019_v53 = vpop.trf.xlu1  ;;  %v988_v54 = vpop.trf.xlu0 }
 0x34e   : > { %v1036_v58 = vpack.c.bf16 %v1019_v53, %v1018_v50 }
 0x351   : > { %v1020_v55 = vpop.trf.xlu1  ;;  %v989_v56 = vpop.trf.xlu0 }
 0x352   : > { %v1035_v57 = vpack.c.bf16 %v989_v56, %v988_v54 }
 0x354   : > { %1865 = vmatmul.mubr.msk.bf16.vlgmr.msra.gmra.mxu0 %vm1046_vm8, %v1035_v57 }
 0x355   : > { %1868 = vmatprep.mubr.msk.bf16.mxu0 %vm1046_vm8, %v1036_v58  ;;  %v1021_v59 = vpop.trf.xlu1 }
 0x356   : > { %v1037_v60 = vpack.c.bf16 %v1021_v59, %v1020_v55 }
 0x35c   : > { %1869 = vmatmul.mubr.msk.bf16.gmra.mxu0 %vm1046_vm8, %v1037_v60 }
 0x414   : > { %v1866_v63 = vpop.f32.mrf.mxu0 }
 0x415   : > { %v1106_v3 = vadd.f32 %v1866_v63, %v1811_v0 }
 0x416   : > { %v1097_v1 = vpop.f32.mrf.mxu0 }
 0x417   : > { %v1098_v2 = vadd.f32 %v1811_v0, %v1097_v1  ;;  %v1138_v10 = vmul.f32 0.2, %v1106_v3  ;;  %vm1130_vm11 = vcmp.ge.f32.partialorder %v1106_v3, 0.0 }
 0x418   : > { %v1867_v4 = vpop.f32.mrf.mxu0 }
 0x419   : > { %v1109_v5 = vadd.f32 %v1867_v4, %v1811_v0  ;;  %v1136_v7 = vmul.f32 0.2, %v1098_v2  ;;  %vm1128_vm10 = vcmp.ge.f32.partialorder %v1098_v2, 0.0  ;;  %v1146_v20 = vsel %vm1130_vm11, %v1106_v3, %v1138_v10  ;;  %v2018_v10 = vld [vmem:[%s2727_s30 + $0x8] sm:$0xff]  }
 0x41a   : > { %v1100_v6 = vpop.f32.mrf.mxu0 }
 0x41b   : > { %vm1131_vm9 = vcmp.ge.f32.partialorder %v1109_v5, 0.0  ;;  %v1139_v8 = vmul.f32 0.2, %v1109_v5  ;;  %v1101_v9 = vadd.f32 %v1811_v0, %v1100_v6  ;;  %v1144_v16 = vsel %vm1128_vm10, %v1098_v2, %v1136_v7  ;;  %v2016_v7 = vld [vmem:[%s2721_s3 + $0x8] sm:$0xff]  }
 0x41c   : > { %v1870_v11 = vpop.f32.mrf.mxu0 }
 0x41d   : > { %v1137_v12 = vmul.f32 0.2, %v1101_v9  ;;  %vm1129_vm12 = vcmp.ge.f32.partialorder %v1101_v9, 0.0  ;;  %v1147_v13 = vsel %vm1131_vm9, %v1109_v5, %v1139_v8  ;;  %v1122_v21 = vadd.f32 %v1870_v11, %v1811_v0 }
 0x41e   : > { %v1113_v14 = vpop.f32.mrf.mxu0  ;;  %v1153_v24 = vpack.c.bf16 %v1147_v13, %v1146_v20  ;;  %v2387_v8 = vmov 0.0  }
 0x41f   : > { %v1114_v15 = vadd.f32 %v1811_v0, %v1113_v14  ;;  %v1145_v19 = vsel %vm1129_vm12, %v1101_v9, %v1137_v12  ;;  %v1142_v30 = vmul.f32 0.2, %v1122_v21  ;;  %vm1134_vm15 = vcmp.ge.f32.partialorder %v1122_v21, 0.0  ;;  %1882 = vmatprep.subr.bf16.mxu0 %v2387_v8  ;;  %1890 = vmatprep.subr.bf16.mxu1 %v2387_v8  ;;  %v2017_v9 = vld [vmem:[%s2721_s3] sm:$0xff]   ;;  %s2912_s3 = scalar_lea.vmem [#allocation12], %s2675_s29 }
 0x420   : > { %v1871_v22 = vpop.f32.mrf.mxu0  ;;  %v1152_v23 = vpack.c.bf16 %v1145_v19, %v1144_v16  ;;  %1883 = vmatpush3.bf16.msra.mxu0 %v2016_v7  ;;  %1886 = vmatprep.mubr.msk.bf16.mxu0 %vm2388_vm1, %v2387_v8 }
 0x421   : > { %v1125_v25 = vadd.f32 %v1871_v22, %v1811_v0  ;;  %v1140_v27 = vmul.f32 0.2, %v1114_v15  ;;  %vm1132_vm14 = vcmp.ge.f32.partialorder %v1114_v15, 0.0  ;;  %v1150_v35 = vsel %vm1134_vm15, %v1122_v21, %v1142_v30  ;;  %1884 = vmatprep.subr.bf16.mxu0 %v2387_v8  ;;  %v1821_v21 = vld [vmem:[%s2912_s3] ss:$0 sm:$0xff]  ;;  %v2019_v30 = vld [vmem:[%s2727_s30] sm:$0xff]  }
 0x422   : > { %v1116_v26 = vpop.f32.mrf.mxu0  ;;  %1874 = vmatprep.mubr.msk.bf16.mxu1 %vm1046_vm8, %v1152_v23 }
 0x423   : > { %vm1135_vm13 = vcmp.ge.f32.partialorder %v1125_v25, 0.0  ;;  %v1143_v28 = vmul.f32 0.2, %v1125_v25  ;;  %v1117_v29 = vadd.f32 %v1811_v0, %v1116_v26  ;;  %1875 = vmatmul.mubr.msk.bf16.vlgmr.msra.gmra.mxu1 %vm1046_vm8, %v1153_v24  ;;  %v1148_v33 = vsel %vm1132_vm14, %v1114_v15, %v1140_v27 }
 0x424   : > { %1885 = vmatpush3.bf16.msra.mxu0 %v2017_v9  ;;  %1891 = vmatpush3.bf16.msra.mxu1 %v2018_v10 }
 0x425   : > { %vm1133_vm0 = vcmp.ge.f32.partialorder %v1117_v29, 0.0  ;;  %v1141_v31 = vmul.f32 0.2, %v1117_v29  ;;  %v1151_v32 = vsel %vm1135_vm13, %v1125_v25, %v1143_v28  ;;  %1892 = vmatprep.subr.bf16.mxu1 %v2387_v8  ;;  %v1822_v25 = vld [vmem:[%s2913_s13] ss:$0 sm:$0xff] }
 0x426   : > { %v1155_v37 = vpack.c.bf16 %v1151_v32, %v1150_v35 }
 0x427   : > { %v1149_v34 = vsel %vm1133_vm0, %v1117_v29, %v1141_v31  ;;  %v1823_v31 = vld [vmem:[%s2914_s11] ss:$0 sm:$0xff] }
 0x428   : > { %v1154_v36 = vpack.c.bf16 %v1149_v34, %v1148_v33  ;;  %1893 = vmatpush3.bf16.msra.mxu1 %v2019_v30 }
 0x42a   : > { %1878 = vmatprep.mubr.msk.bf16.mxu1 %vm1046_vm8, %v1154_v36 }
 0x42b   : > { %1879 = vmatmul.mubr.msk.bf16.gmra.mxu1 %vm1046_vm8, %v1155_v37 }
 0x42c   : > { %1894 = vmatprep.mubr.msk.bf16.mxu1 %vm2388_vm1, %v2387_v8 }
 0x4e3   : > { %v1876_v38 = vpop.f32.mrf.mxu1 }
 0x4e4   : > { %v1222_v47 = vadd.f32 %v1876_v38, %v1816_v39 }
 0x4e5   : > { %v1213_v40 = vpop.f32.mrf.mxu1 }
 0x4e6   : > { %v1214_v41 = vadd.f32 %v1816_v39, %v1213_v40 }
 0x4e7   : > { %v1877_v42 = vpop.f32.mrf.mxu1 }
 0x4e8   : > { %1244 = vxpose.xlu0.b32.start [1/4] (short) (narrow) %v1214_v41, 8  ;;  %v1225_v51 = vadd.f32 %v1877_v42, %v1816_v39 }
 0x4e9   : > { %v1216_v43 = vpop.f32.mrf.mxu1 }
 0x4ea   : > { %v1217_v44 = vadd.f32 %v1816_v39, %v1216_v43  ;;  %v1827_v43 = vld [vmem:[%s846_s4] ss:$0 sm:$0xff] }
 0x4eb   : > { %v1880_v45 = vpop.f32.mrf.mxu1 }
 0x4ec   : > { %1245 = vxpose.xlu0.b32.cont [2/4] (short) (narrow) %v1217_v44, 8  ;;  %v1238_v53 = vadd.f32 %v1880_v45, %v1816_v39 }
 0x4ed   : > { %v1229_v46 = vpop.f32.mrf.mxu1 }
 0x4ee   : > { %v1230_v48 = vadd.f32 %v1816_v39, %v1229_v46 }
 0x4ef   : > { %v1881_v49 = vpop.f32.mrf.mxu1 }
 0x4f0   : > { %1276 = vxpose.xlu1.b32.start [1/4] (short) (narrow) %v1230_v48, 8  ;;  %1246 = vxpose.xlu0.b32.cont [3/4] (short) (narrow) %v1222_v47, 8  ;;  %v1241_v54 = vadd.f32 %v1881_v49, %v1816_v39 }
 0x4f1   : > { %v1232_v50 = vpop.f32.mrf.mxu1 }
 0x4f2   : > { %v1233_v52 = vadd.f32 %v1816_v39, %v1232_v50 }
 0x4f4   : > { %1277 = vxpose.xlu1.b32.cont [2/4] (short) (narrow) %v1233_v52, 8  ;;  %1247 = vxpose.xlu0.b32.end [4/4] (short) (narrow) %v1225_v51, 8 }
 0x4f8   : > { %1278 = vxpose.xlu1.b32.cont [3/4] (short) (narrow) %v1238_v53, 8 }
 0x4fc   : > { %1279 = vxpose.xlu1.b32.end [4/4] (short) (narrow) %v1241_v54, 8 }
 0x564   : > { %v1260_v55 = vpop.trf.xlu0 }
 0x565   : > { %v1308_v56 = vadd.f32 %v1260_v55, %v2739_v17 }
 0x567   : > { %1310 = vst.msk [vmem:[#allocation2] sm:$0xff] %vm926_vm6, %v1308_v56 }
 0x56c   : > { %v1292_v57 = vpop.trf.xlu1 }
 0x56d   : > { %v1309_v58 = vadd.f32 %v1292_v57, %v2741_v18 }
 0x56e   : > { %v2779_v59 = vld [vmem:[#allocation2] sm:$0xff] }
 0x56f   : > { %1311 = vst.msk [vmem:[#allocation2 + $0x8] sm:$0xff] %vm926_vm6, %v1309_v58  ;;  %v1316_v60 = vsel %vm926_vm6, %v2779_v59, 0.0 }
 0x570   : > { %1317 = vadd.xlane.f32.xlu0 %v1316_v60 }
 0x576   : > { %v2784_v61 = vld [vmem:[#allocation2 + $0x8] sm:$0xff] }
 0x577   : > { %v1319_v62 = vsel %vm926_vm6, %v2784_v61, 0.0 }
 0x578   : > { %1320 = vadd.xlane.f32.xlu1 %v1319_v62 }
 0x5f9   : > { %v1318_v17 = vpop.xlane.xlu0 %1317 }
 0x5fa   : > { %v1322_v63 = vmul.f32 0.03125, %v1318_v17 }
 0x5fc   : > { %v1324_v0 = vsub.f32 %v2779_v59, %v1322_v63 }
 0x5fe   : > { %v1326_v18 = vmul.f32 %v1324_v0, %v1324_v0 }
 0x600   : > { %v1328_v1 = vsel %vm926_vm6, %v1326_v18, 0.0 }
 0x601   : > { %v1321_v2 = vpop.xlane.xlu1 %1320  ;;  %1329 = vadd.xlane.f32.xlu0 %v1328_v1 }
 0x602   : > { %v1323_v3 = vmul.f32 0.03125, %v1321_v2 }
 0x604   : > { %v1325_v4 = vsub.f32 %v2784_v61, %v1323_v3 }
 0x606   : > { %v1327_v5 = vmul.f32 %v1325_v4, %v1325_v4 }
 0x608   : > { %v1331_v6 = vsel %vm926_vm6, %v1327_v5, 0.0 }
 0x609   : > { %1332 = vadd.xlane.f32.xlu1 %v1331_v6 }
 0x68a   : > { %v1330_v11 = vpop.xlane.xlu0 %1329 }
 0x68b   : > { %v1334_v12 = vmul.f32 0.03125, %v1330_v11 }
 0x68d   : > { %v1336_v13 = vadd.f32 1e-05, %v1334_v12 }
 0x68f   : > { %2024 = vrsqrt.f32 %v1336_v13 }
 0x692   : > { %v1333_v14 = vpop.xlane.xlu1 %1332 }
 0x693   : > { %v1335_v15 = vmul.f32 0.03125, %v1333_v14 }
 0x695   : > { %v1337_v16 = vadd.f32 1e-05, %v1335_v15 }
 0x697   : > { %2026 = vrsqrt.f32 %v1337_v16 }
 0x69c   : > { %v2025_v19 = vpop.eup %2024 }
 0x69d   : > { %v1340_v20 = vmul.f32 %v2025_v19, %v1324_v0 }
 0x69f   : > { %v1348_v23 = vmul.f32 %v1821_v21, %v1340_v20 }
 0x6a1   : > { %v1356_v27 = vadd.f32 %v1822_v25, %v1348_v23 }
 0x6a4   : > { %v2027_v22 = vpop.eup %2026 }
 0x6a5   : > { %v1341_v24 = vmul.f32 %v2027_v22, %v1325_v4 }
 0x6a7   : > { %v1349_v26 = vmul.f32 %v1821_v21, %v1341_v24 }
 0x6a9   : > { %v1357_v28 = vadd.f32 %v1822_v25, %v1349_v26 }
 0x6ab   : > { %v1358_v29 = vpack.c.bf16 %v1357_v28, %v1356_v27 }
 0x6ad   : > { %1887 = vmatmul.mubr.msk.bf16.vlgmr.msra.gmra.mxu0 %vm926_vm6, %v1358_v29 }
 0x76d   : > { %v1419_v32 = vpop.f32.mrf.mxu0 }
 0x76e   : > { %v1420_v33 = vadd.f32 %v1823_v31, %v1419_v32 }
 0x76f   : > { %v1888_v34 = vpop.f32.mrf.mxu0 }
 0x770   : > { %v1428_v36 = vmul.f32 0.2, %v1420_v33  ;;  %vm1426_vm2 = vcmp.ge.f32.partialorder %v1420_v33, 0.0 }
 0x771   : > { %v1422_v35 = vpop.f32.mrf.mxu0 }
 0x772   : > { %v1423_v37 = vadd.f32 %v1823_v31, %v1422_v35  ;;  %v1430_v40 = vsel %vm1426_vm2, %v1420_v33, %v1428_v36 }
 0x773   : > { %v1889_v38 = vpop.f32.mrf.mxu0 }
 0x774   : > { %vm1427_vm3 = vcmp.ge.f32.partialorder %v1423_v37, 0.0  ;;  %v1429_v39 = vmul.f32 0.2, %v1423_v37 }
 0x776   : > { %v1431_v41 = vsel %vm1427_vm3, %v1423_v37, %v1429_v39 }
 0x777   : > { %v1432_v42 = vpack.c.bf16 %v1431_v41, %v1430_v40 }
 0x779   : > { %1895 = vmatmul.mubr.msk.bf16.vlgmr.msra.gmra.mxu1 %vm926_vm6, %v1432_v42 }
 0x839   : > { %v1493_v44 = vpop.f32.mrf.mxu1 }
 0x83a   : > { %v1494_v45 = vadd.f32 %v1827_v43, %v1493_v44 }
 0x83b   : > { %v1896_v46 = vpop.f32.mrf.mxu1 }
 0x83c   : > { %v1500_v47 = vadd.f32 %v1494_v45, %v2779_v59 }
 0x83d   : > { %v1496_v48 = vpop.f32.mrf.mxu1 }
 0x83e   : > { %1502 = vst.msk [vmem:[#allocation2] sm:$0xff] %vm926_vm6, %v1500_v47  ;;  %v1497_v49 = vadd.f32 %v1827_v43, %v1496_v48  ;;  %1507 = sbr.rel (%p1831_p3) target bundleno = 2116 (0x844), region = 124 }
 0x83f   : > { %v1897_v50 = vpop.f32.mrf.mxu1 }
 0x840   : > { %v1501_v51 = vadd.f32 %v1497_v49, %v2784_v61 }
 0x842   : > { %1503 = vst.msk [vmem:[#allocation2 + $0x8] sm:$0xff] %vm926_vm6, %v1501_v51 }
 0x843   : > { %1508 = vst.msk [vmem:[#allocation18] sm:$0xff] %vm926_vm6, %v1500_v47  ;;  %1509 = vst.msk [vmem:[#allocation18 + $0x8] sm:$0xff] %vm926_vm6, %v1501_v51 }
 0x844 PF: > { %p1956_p4 = scmp.eq.s32.totalorder %s2583_s5, 1  ;;  %s2389_s1 = smov [#allocation18]  }
 0x845   : > { %s1519_s4 = sshll.u32 %s2389_s1, 4  ;;  %s1520_s4 = int_to_ptr.vmem [resolvable:$true] %s1519_s4 }
 0x846   : > { %s2278_s25 = scalar_lea.vmem %s1520_s4, 256  ;;  %p2285_p5 = scmp.lt.s32.totalorder %s1520_s4, %s1520_s4 }
 0x847   : > { %p2279_p8 = scmp.ne.s32.totalorder %s1520_s4, %s2278_s25  ;;  %p2286_p11 = scmp.lt.s32.totalorder %s2278_s25, %s2278_s25 }
 0x849   : > { %p2280_p9 = pnand %p2279_p8, %p1956_p4  ;;  %p2287_p12 = por %p2286_p11, %p2285_p5 }
 0x84b   : > { %p2281_p10 = pneg %p2280_p9 }
 0x84d   : > { %p2288_p0 = pnand %p2287_p12, %p2281_p10 }
 0x84f   : > { %2291 = shalt.err (!%p2288_p0)
}
 0x850   : > { %s2390_s27 = smov 128   ;;  %s2391_s17 = smov 8  }
 0x851   : > { %s2917_s6 = sld [smem:[#allocation40_spill]] }
 0x857   : > { %1921 = dma.vmem_to_hbm [thread:$0]  (%p1956_p4), %s1520_s4, 256, %s2917_s6, [#allocation5], %s2390_s27, %s2390_s27, %s2391_s17  }
 0x858   : > { %2347 = dma.done.wait (%p1956_p4), [#allocation5], 256  }
 0x859   : > { %2349 = vsyncadd (%p1956_p4), [#allocation5], 4294967040 }
 0x85a PF: > { %s39_s23 = sadd.s32 1, %s2372_s23   ;;  %s2918_s24 = sld [smem:[#allocation25_spill]] }
 0x85b   : > { %p36_p13 = scmp.ge.s32.totalorder %s39_s23, 4   ;;  %s2919_s20 = sld [smem:[#allocation28_spill]] }
 0x85c   : > { %s2920_s16 = sld [smem:[#allocation27_spill]]  ;;  %s2921_s18 = smov %s2356_s19 }
 0x85d   : > { %s2923_s21 = smov %s2368_s22 }
 0x85e   :  { %38 = sbr.rel (!%p36_p13) target bundleno = 25 (0x19), region = 229 }
 0x860   : > { %s2922_s19 = smov %s2918_s24 }
 0x862   : > { %s2924_s22 = smov %s2920_s16 }
 0x863   :  { %1535 = vsyncpa [#allocation4], 1 }
 0x864   :  { %1537 = vsyncpa [#allocation4 + $0x1], 1 }
 0x865   :  { %1538 = vsyncpa [#allocation7], 1 }
 0x866   :  { %1540 = vsyncpa [#allocation7 + $0x1], 1 }
 0x867   :  { %1541 = vsyncpa [#allocation10], 1 }
 0x868   :  { %1543 = vsyncpa [#allocation10 + $0x1], 1 }
 0x869   :  { %1544 = vsyncpa [#allocation13], 1 }
 0x86a   :  { %1546 = vsyncpa [#allocation13 + $0x1], 1 }
 0x86b   :  { %1547 = vsyncpa [#allocation16], 1 }
 0x86c   :  { %1549 = vsyncpa [#allocation16 + $0x1], 1 }
 0x86d   :  { %1550 = vsyncpa [#allocation5], 1 }
 0x86e   :  { %1552 = vsyncpa [#allocation5 + $0x1], 1 }

</bundles_post_ra>
